<compile_context>
chip_gen: v7x
topology: tpu7x:2x2x1
jax: 0.10.0
libtpu: 0.0.40
codegen_flags: <defaults>
</compile_context>

<pallas_src>
import jax
import jax.numpy as jnp
from jax.experimental import pallas as pl
from jax.experimental.pallas import tpu as pltpu

_LANE = 128
_SUBLANE = 8


def _round_up(x, m):
    return ((x + m - 1) // m) * m


def _cdiv(a, b):
    return -(-a // b)


def _make_kernel(negative_slope, compute_dtype, nc_p):
    def kernel(img_ref, lab_ref, w1i_ref, tab_ref, b1_ref,
               w2_ref, b2_ref, w3_ref, b3_ref, o_ref):
        # img: (tm, d_img_p) in compute_dtype (already cast in the wrapper).
        # lab: (tm, 1) int32 class ids.
        # Weights are VMEM-resident (index_map -> (0,0)) and pre-cast; no
        # per-step .astype on them.
        img = img_ref[...]
        tm = img.shape[0]

        # one_hot(labels) @ (emb @ W1_lab)  ==  emb[labels] @ W1_lab
        lab = lab_ref[...]                                          # (tm, 1) int32
        classes = jax.lax.broadcasted_iota(jnp.int32, (tm, nc_p), 1)
        onehot = (lab == classes).astype(compute_dtype)             # (tm, nc_p)

        # fc1 (concat fused away; label path is the tiny one-hot matmul)
        h1 = (jnp.dot(img, w1i_ref[...], preferred_element_type=jnp.float32)
              + jnp.dot(onehot, tab_ref[...], preferred_element_type=jnp.float32)
              + b1_ref[...])
        h1 = jnp.where(h1 >= 0, h1, negative_slope * h1)            # LeakyReLU(0.2)
        # Dropout(0.3) -> identity (eval mode)

        # fc2
        h2 = (jnp.dot(h1.astype(compute_dtype), w2_ref[...],
                      preferred_element_type=jnp.float32)
              + b2_ref[...])
        h2 = jnp.where(h2 >= 0, h2, negative_slope * h2)            # LeakyReLU(0.2)
        # Dropout(0.3) -> identity (eval mode)

        # fc3 -- lane-dense (tm, 128) output slab; real logit lives in column 0.
        out = (jnp.dot(h2.astype(compute_dtype), w3_ref[...],
                       preferred_element_type=jnp.float32)
               + b3_ref[...])
        o_ref[...] = out.astype(o_ref.dtype)

    return kernel


def prepare_params(params, *, compute_dtype=jnp.bfloat16):
    """Pad + cast weights once (hoisted out of the per-call forward path)."""
    emb = params["emb"].astype(jnp.float32)
    w1 = params["w1"].astype(jnp.float32)
    b1 = params["b1"].astype(jnp.float32)
    w2 = params["w2"].astype(jnp.float32)
    b2 = params["b2"].astype(jnp.float32)
    w3 = params["w3"].astype(jnp.float32)
    b3 = params["b3"].astype(jnp.float32)

    nc = emb.shape[0]
    d_in, h = w1.shape
    d_img = d_in - nc

    d_img_p = _round_up(d_img, _LANE)
    h_p = _round_up(h, _LANE)
    nc_p = _round_up(nc, _SUBLANE)
    out_p = _LANE

    w1_img = w1[:d_img]
    w1_lab = w1[d_img:]
    class_tab = emb @ w1_lab                      # (nc, h): embedding folded into fc1

    return {
        "w1_img": jnp.pad(w1_img, ((0, d_img_p - d_img), (0, h_p - h))).astype(compute_dtype),
        "tab": jnp.pad(class_tab, ((0, nc_p - nc), (0, h_p - h))).astype(compute_dtype),
        "b1": jnp.pad(b1.reshape(1, -1), ((0, 0), (0, h_p - h))),
        "w2": jnp.pad(w2, ((0, h_p - h), (0, h_p - h))).astype(compute_dtype),
        "b2": jnp.pad(b2.reshape(1, -1), ((0, 0), (0, h_p - h))),
        "w3": jnp.pad(w3, ((0, h_p - h), (0, out_p - w3.shape[1]))).astype(compute_dtype),
        "b3": jnp.pad(b3.reshape(1, -1), ((0, 0), (0, out_p - b3.reshape(1, -1).shape[1]))),
    }


def _vmem_estimate(tm, d_img_p, h_p, nc_p, out_p, cdt_bytes):
    weights = (d_img_p * h_p + nc_p * h_p + h_p * h_p + h_p * out_p) * cdt_bytes
    biases = (2 * h_p + out_p) * 4
    streamed = 2 * tm * (d_img_p * cdt_bytes + 4) + 2 * tm * out_p * 4   # dbl-buffered in/out
    return weights + biases + streamed


def discriminator_forward(image, labels, prep, *, tile_m=512, negative_slope=0.2,
                          vmem_limit_bytes=32 * 1024 * 1024):
    """image: (B, C, H, W) float, labels: (B,) int -> (B, 1) float32 logits."""
    w1_img, tab = prep["w1_img"], prep["tab"]
    b1, w2, b2, w3, b3 = prep["b1"], prep["w2"], prep["b2"], prep["w3"], prep["b3"]

    compute_dtype = w1_img.dtype
    cdt_bytes = jnp.dtype(compute_dtype).itemsize
    d_img_p, h_p = w1_img.shape
    nc_p = tab.shape[0]
    out_p = w3.shape[1]

    B = image.shape[0]
    img_flat = image.reshape(B, -1)                      # Flatten (glue)
    d_img = img_flat.shape[1]
    assert d_img <= d_img_p, (d_img, d_img_p)

    # --- batch tile selection ---------------------------------------------
    tm = min(tile_m, _round_up(B, _SUBLANE))
    # If one tile would cover a reasonably large batch, split into two so the
    # "parallel" grid axis has >= 2 steps (v7x megacore can use both TCs).
    if tm > 2 * _SUBLANE and tm == _round_up(B, _SUBLANE):
        tm = _round_up(_cdiv(tm, 2), _SUBLANE)
    # Keep resident weights + double-buffered tiles under the VMEM budget.
    budget = int(0.75 * vmem_limit_bytes)
    while tm > _SUBLANE and _vmem_estimate(tm, d_img_p, h_p, nc_p, out_p, cdt_bytes) > budget:
        tm = max(_SUBLANE, _round_up(tm // 2, _SUBLANE))

    b_p = _round_up(B, tm)
    grid = (b_p // tm,)

    # --- inputs: cast once, pad only the axes that need it -----------------
    img = img_flat.astype(compute_dtype)
    if b_p != B or d_img_p != d_img:
        img = jnp.pad(img, ((0, b_p - B), (0, d_img_p - d_img)))
    lab = labels.astype(jnp.int32).reshape(B, 1)
    if b_p != B:
        lab = jnp.pad(lab, ((0, b_p - B), (0, 0)))       # pad rows -> class 0 (sliced away)

    kernel = _make_kernel(negative_slope, compute_dtype, nc_p)

    out = pl.pallas_call(
        kernel,
        out_shape=jax.ShapeDtypeStruct((b_p, out_p), jnp.float32),
        grid=grid,
        in_specs=[
            pl.BlockSpec((tm, d_img_p), lambda i: (i, 0)),   # pipelined batch tile
            pl.BlockSpec((tm, 1), lambda i: (i, 0)),         # int32 labels, 4 B/row
            pl.BlockSpec((d_img_p, h_p), lambda i: (0, 0)),  # weights stay resident
            pl.BlockSpec((nc_p, h_p), lambda i: (0, 0)),
            pl.BlockSpec((1, h_p), lambda i: (0, 0)),
            pl.BlockSpec((h_p, h_p), lambda i: (0, 0)),
            pl.BlockSpec((1, h_p), lambda i: (0, 0)),
            pl.BlockSpec((h_p, out_p), lambda i: (0, 0)),
            pl.BlockSpec((1, out_p), lambda i: (0, 0)),
        ],
        out_specs=pl.BlockSpec((tm, out_p), lambda i: (i, 0)),
        compiler_params=pltpu.CompilerParams(
            dimension_semantics=("parallel",),               # megacore on v7x
            vmem_limit_bytes=vmem_limit_bytes,
        ),
    )(img, lab, w1_img, tab, b1, w2, b2, w3, b3)

    return out[:B, :1]


def init_params(key, img_size, num_classes, num_hiddens, in_channels=1):
    d_in = img_size * img_size * in_channels + num_classes
    k = jax.random.split(key, 7)
    scale1 = 1.0 / jnp.sqrt(d_in)
    scale2 = 1.0 / jnp.sqrt(num_hiddens)
    return {
        "emb": jax.random.normal(k[0], (num_classes, num_classes), jnp.float32),
        # weights stored (in, out) so the model computes x @ W + b
        "w1": jax.random.uniform(k[1], (d_in, num_hiddens), jnp.float32, -scale1, scale1),
        "b1": jax.random.uniform(k[2], (1, num_hiddens), jnp.float32, -scale1, scale1),
        "w2": jax.random.uniform(k[3], (num_hiddens, num_hiddens), jnp.float32, -scale2, scale2),
        "b2": jax.random.uniform(k[4], (1, num_hiddens), jnp.float32, -scale2, scale2),
        "w3": jax.random.uniform(k[5], (num_hiddens, 1), jnp.float32, -scale2, scale2),
        "b3": jax.random.uniform(k[6], (1, 1), jnp.float32, -scale2, scale2),
    }


def reference_forward(image, labels, params):
    """Pure-JAX f32 reference (Dropout = identity / eval mode)."""
    B = image.shape[0]
    x = jnp.concatenate([image.reshape(B, -1), params["emb"][labels]], axis=1)
    h1 = x @ params["w1"] + params["b1"]
    h1 = jnp.where(h1 >= 0, h1, 0.2 * h1)
    h2 = h1 @ params["w2"] + params["b2"]
    h2 = jnp.where(h2 >= 0, h2, 0.2 * h2)
    return h2 @ params["w3"] + params["b3"]


if __name__ == "__main__":
    img_size = 16
    num_classes = 4
    num_hiddens = 32
    in_channels = 1
    batch = 2

    key = jax.random.PRNGKey(0)
    k_img, k_lab, k_par = jax.random.split(key, 3)

    image = jax.random.normal(k_img, (batch, in_channels, img_size, img_size), jnp.float32)
    labels = jax.random.randint(k_lab, (batch,), 0, num_classes, jnp.int32)
    params = init_params(k_par, img_size, num_classes, num_hiddens, in_channels)

    ref = reference_forward(image, labels, params)

    # f32 matmul path: bit-tight against the f32 reference.
    prep_f32 = prepare_params(params, compute_dtype=jnp.float32)
    out_f32 = jax.block_until_ready(discriminator_forward(image, labels, prep_f32))
    assert out_f32.shape == (batch, 1), out_f32.shape
    assert jnp.allclose(out_f32, ref, atol=1e-4, rtol=1e-4), (out_f32, ref)

    # bf16 matmul path (default for prod: ~2-4x MXU throughput, half the HBM
    # bytes on the dominant image stream); f32 accumulation, looser tolerance.
    prep_bf16 = prepare_params(params, compute_dtype=jnp.bfloat16)
    out_bf16 = jax.block_until_ready(discriminator_forward(image, labels, prep_bf16))
    assert out_bf16.shape == (batch, 1), out_bf16.shape
    assert jnp.allclose(out_bf16, ref, atol=5e-2, rtol=5e-2), (out_bf16, ref)

    print("KERNEL_OK")
</pallas_src>

<mosaic_0001>
module attributes {stable_mosaic.version = 11 : i64} {
  func.func @kernel(%arg0: i32, %arg1: memref<8x256xf32, #tpu.memory_space<vmem>>, %arg2: memref<8x1xi32, #tpu.memory_space<vmem>>, %arg3: memref<256x128xf32, #tpu.memory_space<vmem>>, %arg4: memref<8x128xf32, #tpu.memory_space<vmem>>, %arg5: memref<1x128xf32, #tpu.memory_space<vmem>>, %arg6: memref<128x128xf32, #tpu.memory_space<vmem>>, %arg7: memref<1x128xf32, #tpu.memory_space<vmem>>, %arg8: memref<128x128xf32, #tpu.memory_space<vmem>>, %arg9: memref<1x128xf32, #tpu.memory_space<vmem>>, %arg10: memref<8x128xf32, #tpu.memory_space<vmem>>) attributes {dimension_semantics = [#tpu.dimension_semantics<parallel>], iteration_bounds = array<i64: 1>, scalar_prefetch = 0 : i64, scratch_operands = 0 : i64, tpu.core_type = #tpu.core_type<tc>, window_params = [{transform_indices = @transform_0, window_bounds = array<i64: 8, 256>}, {transform_indices = @transform_1, window_bounds = array<i64: 8, 1>}, {pipeline_mode = #tpu.pipeline_mode<synchronous>, transform_indices = @transform_2, window_bounds = array<i64: 256, 128>}, {pipeline_mode = #tpu.pipeline_mode<synchronous>, transform_indices = @transform_3, window_bounds = array<i64: 8, 128>}, {pipeline_mode = #tpu.pipeline_mode<synchronous>, transform_indices = @transform_4, window_bounds = array<i64: 1, 128>}, {pipeline_mode = #tpu.pipeline_mode<synchronous>, transform_indices = @transform_5, window_bounds = array<i64: 128, 128>}, {pipeline_mode = #tpu.pipeline_mode<synchronous>, transform_indices = @transform_6, window_bounds = array<i64: 1, 128>}, {pipeline_mode = #tpu.pipeline_mode<synchronous>, transform_indices = @transform_7, window_bounds = array<i64: 128, 128>}, {pipeline_mode = #tpu.pipeline_mode<synchronous>, transform_indices = @transform_8, window_bounds = array<i64: 1, 128>}, {transform_indices = @transform_9, window_bounds = array<i64: 8, 128>}]} {
    %c0 = arith.constant 0 : index
    %c0_0 = arith.constant 0 : index
    %0 = vector.load %arg1[%c0, %c0_0] : memref<8x256xf32, #tpu.memory_space<vmem>>, vector<8x256xf32>
    %c0_1 = arith.constant 0 : index
    %c0_2 = arith.constant 0 : index
    %1 = vector.load %arg2[%c0_1, %c0_2] : memref<8x1xi32, #tpu.memory_space<vmem>>, vector<8x1xi32>
    %2 = tpu.iota {dimensions = array<i32: 1>} : vector<8x8xi32>
    %3 = vector.broadcast %1 : vector<8x1xi32> to vector<8x8xi32>
    %4 = arith.cmpi eq, %3, %2 : vector<8x8xi32>
    %5 = arith.extui %4 : vector<8x8xi1> to vector<8x8xi32>
    %6 = arith.sitofp %5 : vector<8x8xi32> to vector<8x8xf32>
    %c0_3 = arith.constant 0 : index
    %c0_4 = arith.constant 0 : index
    %7 = vector.load %arg3[%c0_3, %c0_4] : memref<256x128xf32, #tpu.memory_space<vmem>>, vector<256x128xf32>
    %cst = arith.constant dense<0.000000e+00> : vector<8x128xf32>
    %8 = tpu.matmul %0, %7, %cst {dimension_numbers = #tpu.dot_dimension_numbers<[1], [0], [0], [1], [0, 0, 1, 1], [], []>} : vector<8x256xf32>, vector<256x128xf32>, vector<8x128xf32> -> vector<8x128xf32>
    %c0_5 = arith.constant 0 : index
    %c0_6 = arith.constant 0 : index
    %9 = vector.load %arg4[%c0_5, %c0_6] : memref<8x128xf32, #tpu.memory_space<vmem>>, vector<8x128xf32>
    %cst_7 = arith.constant dense<0.000000e+00> : vector<8x128xf32>
    %10 = tpu.matmul %6, %9, %cst_7 {dimension_numbers = #tpu.dot_dimension_numbers<[1], [0], [0], [1], [0, 0, 1, 1], [], []>} : vector<8x8xf32>, vector<8x128xf32>, vector<8x128xf32> -> vector<8x128xf32>
    %11 = arith.addf %8, %10 : vector<8x128xf32>
    %c0_8 = arith.constant 0 : index
    %c0_9 = arith.constant 0 : index
    %12 = vector.load %arg5[%c0_8, %c0_9] : memref<1x128xf32, #tpu.memory_space<vmem>>, vector<1x128xf32>
    %13 = vector.broadcast %12 : vector<1x128xf32> to vector<8x128xf32>
    %14 = arith.addf %11, %13 : vector<8x128xf32>
    %cst_10 = arith.constant 0.000000e+00 : f32
    %15 = vector.broadcast %cst_10 : f32 to vector<8x128xf32>
    %16 = arith.cmpf oge, %14, %15 : vector<8x128xf32>
    %cst_11 = arith.constant 2.000000e-01 : f32
    %17 = vector.broadcast %cst_11 : f32 to vector<8x128xf32>
    %18 = arith.mulf %17, %14 : vector<8x128xf32>
    %19 = arith.select %16, %14, %18 : vector<8x128xi1>, vector<8x128xf32>
    %c0_12 = arith.constant 0 : index
    %c0_13 = arith.constant 0 : index
    %20 = vector.load %arg6[%c0_12, %c0_13] : memref<128x128xf32, #tpu.memory_space<vmem>>, vector<128x128xf32>
    %cst_14 = arith.constant dense<0.000000e+00> : vector<8x128xf32>
    %21 = tpu.matmul %19, %20, %cst_14 {dimension_numbers = #tpu.dot_dimension_numbers<[1], [0], [0], [1], [0, 0, 1, 1], [], []>} : vector<8x128xf32>, vector<128x128xf32>, vector<8x128xf32> -> vector<8x128xf32>
    %c0_15 = arith.constant 0 : index
    %c0_16 = arith.constant 0 : index
    %22 = vector.load %arg7[%c0_15, %c0_16] : memref<1x128xf32, #tpu.memory_space<vmem>>, vector<1x128xf32>
    %23 = vector.broadcast %22 : vector<1x128xf32> to vector<8x128xf32>
    %24 = arith.addf %21, %23 : vector<8x128xf32>
    %cst_17 = arith.constant 0.000000e+00 : f32
    %25 = vector.broadcast %cst_17 : f32 to vector<8x128xf32>
    %26 = arith.cmpf oge, %24, %25 : vector<8x128xf32>
    %cst_18 = arith.constant 2.000000e-01 : f32
    %27 = vector.broadcast %cst_18 : f32 to vector<8x128xf32>
    %28 = arith.mulf %27, %24 : vector<8x128xf32>
    %29 = arith.select %26, %24, %28 : vector<8x128xi1>, vector<8x128xf32>
    %c0_19 = arith.constant 0 : index
    %c0_20 = arith.constant 0 : index
    %30 = vector.load %arg8[%c0_19, %c0_20] : memref<128x128xf32, #tpu.memory_space<vmem>>, vector<128x128xf32>
    %cst_21 = arith.constant dense<0.000000e+00> : vector<8x128xf32>
    %31 = tpu.matmul %29, %30, %cst_21 {dimension_numbers = #tpu.dot_dimension_numbers<[1], [0], [0], [1], [0, 0, 1, 1], [], []>} : vector<8x128xf32>, vector<128x128xf32>, vector<8x128xf32> -> vector<8x128xf32>
    %c0_22 = arith.constant 0 : index
    %c0_23 = arith.constant 0 : index
    %32 = vector.load %arg9[%c0_22, %c0_23] : memref<1x128xf32, #tpu.memory_space<vmem>>, vector<1x128xf32>
    %33 = vector.broadcast %32 : vector<1x128xf32> to vector<8x128xf32>
    %34 = arith.addf %31, %33 : vector<8x128xf32>
    %c0_24 = arith.constant 0 : index
    %c0_25 = arith.constant 0 : index
    %35 = vector.load %arg10[%c0_24, %c0_25] : memref<8x128xf32, #tpu.memory_space<vmem>>, vector<8x128xf32>
    tpu.vector_store %arg10[%c0_24, %c0_25], %34 {strides = array<i32>} : memref<8x128xf32, #tpu.memory_space<vmem>>, vector<8x128xf32>,
    return
  }
  func.func @transform_0(%arg0: i32) -> (i32, i32) {
    %c0_i32 = arith.constant 0 : i32
    %c0_i32_0 = arith.constant 0 : i32
    return %arg0, %c0_i32 : i32, i32
  }
  func.func @transform_1(%arg0: i32) -> (i32, i32) {
    %c0_i32 = arith.constant 0 : i32
    %c0_i32_0 = arith.constant 0 : i32
    return %arg0, %c0_i32 : i32, i32
  }
  func.func @transform_2(%arg0: i32) -> (i32, i32) {
    %c0_i32 = arith.constant 0 : i32
    %c0_i32_0 = arith.constant 0 : i32
    %c0_i32_1 = arith.constant 0 : i32
    return %c0_i32, %c0_i32_0 : i32, i32
  }
  func.func @transform_3(%arg0: i32) -> (i32, i32) {
    %c0_i32 = arith.constant 0 : i32
    %c0_i32_0 = arith.constant 0 : i32
    %c0_i32_1 = arith.constant 0 : i32
    return %c0_i32, %c0_i32_0 : i32, i32
  }
  func.func @transform_4(%arg0: i32) -> (i32, i32) {
    %c0_i32 = arith.constant 0 : i32
    %c0_i32_0 = arith.constant 0 : i32
    %c0_i32_1 = arith.constant 0 : i32
    return %c0_i32, %c0_i32_0 : i32, i32
  }
  func.func @transform_5(%arg0: i32) -> (i32, i32) {
    %c0_i32 = arith.constant 0 : i32
    %c0_i32_0 = arith.constant 0 : i32
    %c0_i32_1 = arith.constant 0 : i32
    return %c0_i32, %c0_i32_0 : i32, i32
  }
  func.func @transform_6(%arg0: i32) -> (i32, i32) {
    %c0_i32 = arith.constant 0 : i32
    %c0_i32_0 = arith.constant 0 : i32
    %c0_i32_1 = arith.constant 0 : i32
    return %c0_i32, %c0_i32_0 : i32, i32
  }
  func.func @transform_7(%arg0: i32) -> (i32, i32) {
    %c0_i32 = arith.constant 0 : i32
    %c0_i32_0 = arith.constant 0 : i32
    %c0_i32_1 = arith.constant 0 : i32
    return %c0_i32, %c0_i32_0 : i32, i32
  }
  func.func @transform_8(%arg0: i32) -> (i32, i32) {
    %c0_i32 = arith.constant 0 : i32
    %c0_i32_0 = arith.constant 0 : i32
    %c0_i32_1 = arith.constant 0 : i32
    return %c0_i32, %c0_i32_0 : i32, i32
  }
  func.func @transform_9(%arg0: i32) -> (i32, i32) {
    %c0_i32 = arith.constant 0 : i32
    %c0_i32_0 = arith.constant 0 : i32
    return %arg0, %c0_i32 : i32, i32
  }
}

</mosaic_0001>

<bundles_post_ra>
// kernel: tpu_custom_call.1
= control target key start
LH: loop header
LB: loop body
LE: loop exit
PB: predicated region body
PF: predicated region fallthrough
CT: control target
= control target key end

     0   :  { %14 = vsyncpa [#allocation3], 0  ;;  %s1022_s0 = inlined_call_operand.hbm [shape: f32[8,256], index: 0, kind: input, shape index: {}]   ;;  %s1023_s1 = inlined_call_operand.vmem [shape: s32[8,1], index: 1, kind: input, shape index: {}]   ;;  %s1024_s2 = inlined_call_operand.hbm [shape: f32[256,128], index: 2, kind: input, shape index: {}]   ;;  %s1025_s3 = inlined_call_operand.vmem [shape: f32[8,128], index: 3, kind: input, shape index: {}]   ;;  %s1026_s4 = inlined_call_operand.vmem [shape: f32[1,128], index: 4, kind: input, shape index: {}]   ;;  %s1027_s5 = inlined_call_operand.hbm [shape: f32[128,128], index: 5, kind: input, shape index: {}]   ;;  %s1028_s6 = inlined_call_operand.vmem [shape: f32[1,128], index: 6, kind: input, shape index: {}]   ;;  %s1029_s7 = inlined_call_operand.hbm [shape: f32[128,128], index: 7, kind: input, shape index: {}]   ;;  %s1030_s8 = inlined_call_operand.vmem [shape: f32[1,128], index: 8, kind: input, shape index: {}]   ;;  %s1031_s9 = inlined_call_operand.hbm [shape: f32[8,128], index: 9, kind: output, shape index: {}]  }
   0x1   :  { %15 = vsyncpa [#allocation6], 0 }
   0x2   :  { %16 = vsyncpa [#allocation9], 0 }
   0x3   :  { %17 = vsyncpa [#allocation4], 0  ;;  %s853_s30 = smov [#allocation5]   ;;  %s735_s13 = scalar_lea.hbm %s1024_s2, 4096 }
   0x4   :  { %s35_s10 = sshll.u32 %s853_s30, 4  ;;  %p736_p0 = scmp.ne.s32.totalorder %s1024_s2, %s735_s13  ;;  %s36_s10 = int_to_ptr.vmem [resolvable:$true] %s35_s10 }
   0x5   :  { %p739_p1 = scmp.lt.u32.totalorder %s735_s13, %s1024_s2 }
   0x7   :  { %p741_p2 = pnand %p739_p1, %p736_p0 }
   0x9   :  { %744 = shalt.err (!%p741_p2)
}
   0xa   :  { %s745_s18 = scalar_lea.vmem %s36_s10, 4096  ;;  %p750_p4 = scmp.lt.s32.totalorder %s36_s10, %s36_s10 }
   0xb   :  { %p746_p3 = scmp.ne.s32.totalorder %s36_s10, %s745_s18  ;;  %p751_p5 = scmp.lt.s32.totalorder %s745_s18, %s745_s18 }
   0xd   :  { %p752_p6 = por %p751_p5, %p750_p4 }
   0xf   :  { %p753_p7 = pnand %p752_p6, %p746_p3 }
  0x11   :  { %756 = shalt.err (!%p753_p7)
}
  0x12   :  { %s854_s19 = smov 128   ;;  %s855_s20 = smov 8  }
  0x13   :  { %41 = dma.hbm_to_vmem [thread:$0]  %s1024_s2, 4096, %s36_s10, [#allocation6], %s854_s19, %s854_s19, %s855_s20  }
  0x14   :  { %s856_s23 = smov [#allocation2]   ;;  %s857_s25 = smov [#allocation7]  }
  0x15   :  { %s24_s24 = sshll.u32 %s856_s23, 4  ;;  %s51_s26 = sshll.u32 %s857_s25, 4  ;;  %s25_s24 = int_to_ptr.vmem [resolvable:$true] %s24_s24  ;;  %s52_s26 = int_to_ptr.vmem [resolvable:$true] %s51_s26 }
  0x16   :  { %s757_s29 = scalar_lea.hbm %s1022_s0, 256 }
  0x17   :  { %p758_p8 = scmp.ne.s32.totalorder %s1022_s0, %s757_s29  ;;  %p761_p9 = scmp.lt.u32.totalorder %s757_s29, %s1022_s0 }
  0x19   :  { %p763_p10 = pnand %p761_p9, %p758_p8 }
  0x1b   :  { %766 = shalt.err (!%p763_p10)
}
  0x1c   :  { %s767_s2 = scalar_lea.vmem %s25_s24, 256  ;;  %p772_p12 = scmp.lt.s32.totalorder %s25_s24, %s25_s24 }
  0x1d   :  { %p768_p11 = scmp.ne.s32.totalorder %s25_s24, %s767_s2  ;;  %p773_p13 = scmp.lt.s32.totalorder %s767_s2, %s767_s2 }
  0x1f   :  { %p774_p0 = por %p773_p13, %p772_p12 }
  0x21   :  { %p775_p1 = pnand %p774_p0, %p768_p11 }
  0x23   :  { %778 = shalt.err (!%p775_p1)
}
  0x24   :  { %27 = dma.hbm_to_vmem [thread:$0]  %s1022_s0, 256, %s25_s24, [#allocation3]  }
  0x25   :  { %s779_s17 = scalar_lea.hbm %s1027_s5, 2048 }
  0x26   :  { %p780_p2 = scmp.ne.s32.totalorder %s1027_s5, %s779_s17  ;;  %p783_p3 = scmp.lt.u32.totalorder %s779_s17, %s1027_s5 }
  0x28   :  { %p785_p4 = pnand %p783_p3, %p780_p2 }
  0x2a   :  { %788 = shalt.err (!%p785_p4)
}
  0x2b   :  { %s789_s25 = scalar_lea.vmem %s52_s26, 2048  ;;  %p794_p6 = scmp.lt.s32.totalorder %s52_s26, %s52_s26 }
  0x2c   :  { %p790_p5 = scmp.ne.s32.totalorder %s52_s26, %s789_s25  ;;  %p795_p7 = scmp.lt.s32.totalorder %s789_s25, %s789_s25 }
  0x2e   :  { %p796_p8 = por %p795_p7, %p794_p6 }
  0x30   :  { %p797_p9 = pnand %p796_p8, %p790_p5 }
  0x32   :  { %800 = shalt.err (!%p797_p9)
}
  0x33   :  { %57 = dma.hbm_to_vmem [thread:$0]  %s1027_s5, 2048, %s52_s26, [#allocation6], %s854_s19, %s854_s19, %s855_s20  }
  0x34   :  { %s858_s27 = smov [#allocation8]   ;;  %s801_s11 = scalar_lea.hbm %s1029_s7, 2048 }
  0x35   :  { %s65_s28 = sshll.u32 %s858_s27, 4  ;;  %p802_p10 = scmp.ne.s32.totalorder %s1029_s7, %s801_s11  ;;  %s66_s28 = int_to_ptr.vmem [resolvable:$true] %s65_s28 }
  0x36   :  { %p805_p11 = scmp.lt.u32.totalorder %s801_s11, %s1029_s7 }
  0x38   :  { %p807_p12 = pnand %p805_p11, %p802_p10 }
  0x3a   :  { %810 = shalt.err (!%p807_p12)
}
  0x3b   :  { %s811_s14 = scalar_lea.vmem %s66_s28, 2048  ;;  %p816_p0 = scmp.lt.s32.totalorder %s66_s28, %s66_s28 }
  0x3c   :  { %p812_p13 = scmp.ne.s32.totalorder %s66_s28, %s811_s14  ;;  %p817_p1 = scmp.lt.s32.totalorder %s811_s14, %s811_s14 }
  0x3e   :  { %p818_p2 = por %p817_p1, %p816_p0 }
  0x40   :  { %p819_p3 = pnand %p818_p2, %p812_p13 }
  0x42   :  { %822 = shalt.err (!%p819_p3)
}
  0x43   :  { %71 = dma.hbm_to_vmem [thread:$0]  %s1029_s7, 2048, %s66_s28, [#allocation9], %s854_s19, %s854_s19, %s855_s20  }
  0x44   :  { %845 = dma.done.wait [#allocation3], 256  }
  0x45   :  { %846 = vsyncadd [#allocation3], 4294967040 }
  0x46   :  { %847 = dma.done.wait [#allocation6], 6144  }
  0x47   :  { %848 = vsyncadd [#allocation6], 4294961152 }
  0x48   :  { %849 = dma.done.wait [#allocation9], 2048  }
  0x49   :  { %850 = vsyncadd [#allocation9], 4294965248  ;;  %v859_v0 = vmov 0   ;;  %v860_v1 = vmov 0.0   ;;  %v88_v2 = vld [vmem:[%s1023_s1] sm:$0xff]  ;;  %v113_v3 = vld [vmem:[#allocation5 + $0x80] sm:$0xff]  ;;  %v89_v55 = vlaneseq }
  0x4a   :  { %734 = vset.pattern.permute.xlu0 %v859_v0  ;;  %568 = vmatprep.subr.mxu0 %v860_v1  ;;  %v114_v4 = vld [vmem:[#allocation5 + $0x88] sm:$0xff]  ;;  %v97_v6 = vld [vmem:[#allocation5] sm:$0xff]  ;;  %v115_v8 = vld [vmem:[#allocation5 + $0x90] sm:$0xff]  ;;  %vm861_vm0 = vmmov 0   ;;  %v862_v36 = vmov 0.0|0.0   ;;  %vm130_vm1 = vcmask 64512  }
  0x4b   :  { %92 = vperm.xlu0 %734, %v88_v2   ;;  %v643_v5 = vpack.c.bf16 %v114_v4, %v113_v3  ;;  %v98_v7 = vld [vmem:[#allocation5 + $0x8] sm:$0xff]  ;;  %v116_v10 = vld [vmem:[#allocation5 + $0x98] sm:$0xff]  ;;  %v99_v11 = vld [vmem:[#allocation5 + $0x10] sm:$0xff]  ;;  %570 = vmatprep.mubr.msk.f32.mxu0 %vm861_vm0, %v860_v1  ;;  %v90_v56 = vand.u32 127, %v89_v55  ;;  %s863_s21 = smov [#allocation10]  }
  0x4c   :  { %v645_v9 = vpack.c.bf16 %v98_v7, %v97_v6  ;;  %v100_v12 = vld [vmem:[#allocation5 + $0x18] sm:$0xff]  ;;  %v647_v13 = vpack.c.bf16 %v116_v10, %v115_v8  ;;  %v117_v14 = vld [vmem:[#allocation5 + $0xa0] sm:$0xff]  ;;  %v118_v15 = vld [vmem:[#allocation5 + $0xa8] sm:$0xff]  ;;  %s481_s22 = sshll.u32 %s863_s21, 4  ;;  %s482_s22 = int_to_ptr.vmem [resolvable:$true] %s481_s22 }
  0x4d   :  { %644 = vmatprep.subr.bf16.mxu1 %v643_v5  ;;  %v649_v16 = vpack.c.bf16 %v100_v12, %v99_v11  ;;  %v651_v17 = vpack.c.bf16 %v118_v15, %v117_v14  ;;  %v101_v18 = vld [vmem:[#allocation5 + $0x20] sm:$0xff]  ;;  %v102_v19 = vld [vmem:[#allocation5 + $0x28] sm:$0xff]  ;;  %v119_v20 = vld [vmem:[#allocation5 + $0xb0] sm:$0xff]  ;;  %s823_s23 = scalar_lea.vmem %s482_s22, 128  ;;  %p828_p5 = scmp.lt.s32.totalorder %s482_s22, %s482_s22 }
  0x4e   :  { %646 = vmatpush3.bf16.msra.mxu1 %v645_v9  ;;  %v120_v21 = vld [vmem:[#allocation5 + $0xb8] sm:$0xff]  ;;  %v653_v22 = vpack.c.bf16 %v102_v19, %v101_v18  ;;  %v103_v24 = vld [vmem:[#allocation5 + $0x30] sm:$0xff]  ;;  %v121_v26 = vld [vmem:[#allocation5 + $0xc0] sm:$0xff]  ;;  %p824_p4 = scmp.ne.s32.totalorder %s482_s22, %s823_s23  ;;  %p829_p6 = scmp.lt.s32.totalorder %s823_s23, %s823_s23 }
  0x4f   :  { %648 = vmatprep.subr.bf16.mxu1 %v647_v13  ;;  %v655_v23 = vpack.c.bf16 %v120_v21, %v119_v20  ;;  %v104_v25 = vld [vmem:[#allocation5 + $0x38] sm:$0xff]  ;;  %v122_v27 = vld [vmem:[#allocation5 + $0xc8] sm:$0xff]  ;;  %v129_v29 = vld [vmem:[%s1025_s3] sm:$0xff] }
  0x50   :  { %v87_v28 = vld [vmem:[#allocation2 + $0x8] sm:$0xff]  ;;  %v657_v30 = vpack.c.bf16 %v104_v25, %v103_v24  ;;  %v659_v31 = vpack.c.bf16 %v122_v27, %v121_v26  ;;  %v105_v32 = vld [vmem:[#allocation5 + $0x40] sm:$0xff]  ;;  %v106_v33 = vld [vmem:[#allocation5 + $0x48] sm:$0xff]  ;;  %569 = vmatpush3.msra.mxu0 %v129_v29  ;;  %p830_p7 = por %p829_p6, %p828_p5 }
  0x51   :  { %268 = vmatprep.mubr.f32.mxu1 %v87_v28  ;;  %v123_v34 = vld [vmem:[#allocation5 + $0xd0] sm:$0xff]  ;;  %v124_v35 = vld [vmem:[#allocation5 + $0xd8] sm:$0xff]  ;;  %675 = vmatprep.subr.bf16.mxu0 %v862_v36  ;;  %v661_v37 = vpack.c.bf16 %v106_v33, %v105_v32  ;;  %v125_v41 = vld [vmem:[#allocation5 + $0xe0] sm:$0xff] }
  0x52   :  { %650 = vmatpush3.bf16.msra.mxu1 %v649_v16  ;;  %v663_v38 = vpack.c.bf16 %v124_v35, %v123_v34  ;;  %v107_v39 = vld [vmem:[#allocation5 + $0x50] sm:$0xff]  ;;  %v108_v40 = vld [vmem:[#allocation5 + $0x58] sm:$0xff]  ;;  %v126_v42 = vld [vmem:[#allocation5 + $0xe8] sm:$0xff]  ;;  %p831_p8 = pnand %p830_p7, %p824_p4 }
  0x53   :  { %652 = vmatprep.subr.bf16.mxu1 %v651_v17  ;;  %v665_v43 = vpack.c.bf16 %v108_v40, %v107_v39  ;;  %v667_v44 = vpack.c.bf16 %v126_v42, %v125_v41  ;;  %v109_v45 = vld [vmem:[#allocation5 + $0x60] sm:$0xff]  ;;  %v110_v46 = vld [vmem:[#allocation5 + $0x68] sm:$0xff]  ;;  %v127_v47 = vld [vmem:[#allocation5 + $0xf0] sm:$0xff] }
  0x54   :  { %v128_v48 = vld [vmem:[#allocation5 + $0xf8] sm:$0xff]  ;;  %v669_v49 = vpack.c.bf16 %v110_v46, %v109_v45  ;;  %v111_v51 = vld [vmem:[#allocation5 + $0x70] sm:$0xff]  ;;  %v285_v57 = vld [vmem:[#allocation7] sm:$0xff] }
  0x55   :  { %v671_v50 = vpack.c.bf16 %v128_v48, %v127_v47  ;;  %v112_v52 = vld [vmem:[#allocation5 + $0x78] sm:$0xff]  ;;  %v86_v54 = vld [vmem:[#allocation2] sm:$0xff]  ;;  %v286_v58 = vld [vmem:[#allocation7 + $0x8] sm:$0xff] }
  0x56   :  { %654 = vmatpush3.bf16.msra.mxu1 %v653_v22  ;;  %v673_v53 = vpack.c.bf16 %v112_v52, %v111_v51  ;;  %v676_v60 = vpack.c.bf16 %v286_v58, %v285_v57  ;;  %v287_v61 = vld [vmem:[#allocation7 + $0x10] sm:$0xff]  ;;  %v288_v62 = vld [vmem:[#allocation7 + $0x18] sm:$0xff]  ;;  %v289_v2 = vld [vmem:[#allocation7 + $0x20] sm:$0xff] }
  0x57   :  { %656 = vmatprep.subr.bf16.mxu1 %v655_v23  ;;  %v679_v0 = vpack.c.bf16 %v288_v62, %v287_v61  ;;  %v290_v3 = vld [vmem:[#allocation7 + $0x28] sm:$0xff]  ;;  %v291_v5 = vld [vmem:[#allocation7 + $0x30] sm:$0xff]  ;;  %v292_v6 = vld [vmem:[#allocation7 + $0x38] sm:$0xff] }
  0x58   :  { %v682_v4 = vpack.c.bf16 %v290_v3, %v289_v2  ;;  %v685_v7 = vpack.c.bf16 %v292_v6, %v291_v5  ;;  %v293_v8 = vld [vmem:[#allocation7 + $0x40] sm:$0xff]  ;;  %v294_v9 = vld [vmem:[#allocation7 + $0x48] sm:$0xff]  ;;  %v296_v11 = vld [vmem:[#allocation7 + $0x58] sm:$0xff] }
  0x59   :  { %v688_v10 = vpack.c.bf16 %v294_v9, %v293_v8  ;;  %v297_v13 = vld [vmem:[#allocation7 + $0x60] sm:$0xff]  ;;  %v298_v14 = vld [vmem:[#allocation7 + $0x68] sm:$0xff]  ;;  %v299_v16 = vld [vmem:[#allocation7 + $0x70] sm:$0xff] }
  0x5a   :  { %658 = vmatpush3.bf16.msra.mxu1 %v657_v30  ;;  %v694_v15 = vpack.c.bf16 %v298_v14, %v297_v13  ;;  %v300_v17 = vld [vmem:[#allocation7 + $0x78] sm:$0xff]  ;;  %v381_v19 = vld [vmem:[#allocation8] sm:$0xff]  ;;  %v382_v20 = vld [vmem:[#allocation8 + $0x8] sm:$0xff] }
  0x5b   :  { %660 = vmatprep.subr.bf16.mxu1 %v659_v31  ;;  %v697_v18 = vpack.c.bf16 %v300_v17, %v299_v16  ;;  %v383_v21 = vld [vmem:[#allocation8 + $0x10] sm:$0xff]  ;;  %v700_v22 = vpack.c.bf16 %v382_v20, %v381_v19  ;;  %v384_v23 = vld [vmem:[#allocation8 + $0x18] sm:$0xff]  ;;  %v385_v25 = vld [vmem:[#allocation8 + $0x20] sm:$0xff] }
  0x5c   :  { %v703_v24 = vpack.c.bf16 %v384_v23, %v383_v21  ;;  %v386_v26 = vld [vmem:[#allocation8 + $0x28] sm:$0xff]  ;;  %v387_v28 = vld [vmem:[#allocation8 + $0x30] sm:$0xff]  ;;  %v388_v29 = vld [vmem:[#allocation8 + $0x38] sm:$0xff] }
  0x5d   :  { %v706_v27 = vpack.c.bf16 %v386_v26, %v385_v25  ;;  %v709_v30 = vpack.c.bf16 %v388_v29, %v387_v28  ;;  %v389_v31 = vld [vmem:[#allocation8 + $0x40] sm:$0xff]  ;;  %v390_v32 = vld [vmem:[#allocation8 + $0x48] sm:$0xff]  ;;  %v391_v34 = vld [vmem:[#allocation8 + $0x50] sm:$0xff] }
  0x5e   :  { %662 = vmatpush3.bf16.msra.mxu1 %v661_v37  ;;  %v712_v33 = vpack.c.bf16 %v390_v32, %v389_v31  ;;  %v392_v35 = vld [vmem:[#allocation8 + $0x58] sm:$0xff]  ;;  %v394_v39 = vld [vmem:[#allocation8 + $0x68] sm:$0xff]  ;;  %v494_v45 = vld [vmem:[%s1026_s4] ss:$0 sm:$0xff] }
  0x5f   :  { %664 = vmatprep.subr.bf16.mxu1 %v663_v38  ;;  %v715_v37 = vpack.c.bf16 %v392_v35, %v391_v34  ;;  %v393_v38 = vld [vmem:[#allocation8 + $0x60] sm:$0xff]  ;;  %v395_v51 = vld [vmem:[#allocation8 + $0x70] sm:$0xff]  ;;  %v396_v52 = vld [vmem:[#allocation8 + $0x78] sm:$0xff] }
  0x60   :  { %v718_v40 = vpack.c.bf16 %v394_v39, %v393_v38 }
  0x62   :  { %666 = vmatpush3.bf16.msra.mxu1 %v665_v43 }
  0x63   :  { %668 = vmatprep.subr.bf16.mxu1 %v667_v44 }
  0x66   :  { %670 = vmatpush3.bf16.msra.mxu1 %v669_v49 }
  0x67   :  { %672 = vmatprep.subr.bf16.mxu1 %v671_v50 }
  0x6a   :  { %674 = vmatpush3.bf16.msra.mxu1 %v673_v53  ;;  %v721_v53 = vpack.c.bf16 %v396_v52, %v395_v51 }
  0x6b   :  { %699 = vmatprep.subr.bf16.mxu1 %v862_v36 }
  0x6d   :  { %269 = vmatmul.mubr.f32.vlgmr.msra.gmra.mrb[0].mxu1 %v86_v54 }
  0x6e   :  { %640 = vmatprep.mubr.msk.f32.mxu1 %vm861_vm0, %v860_v1  ;;  %701 = vmatpush3.bf16.msra.mxu1 %v700_v22 }
  0x6f   :  { %702 = vmatprep.subr.bf16.mxu1 %v862_v36 }
  0x72   :  { %704 = vmatpush3.bf16.msra.mxu1 %v703_v24 }
  0x73   :  { %705 = vmatprep.subr.bf16.mxu1 %v862_v36 }
  0x76   :  { %707 = vmatpush3.bf16.msra.mxu1 %v706_v27 }
  0x77   :  { %708 = vmatprep.subr.bf16.mxu1 %v862_v36 }
  0x7a   :  { %710 = vmatpush3.bf16.msra.mxu1 %v709_v30 }
  0x7b   :  { %711 = vmatprep.subr.bf16.mxu1 %v862_v36 }
  0x7e   :  { %713 = vmatpush3.bf16.msra.mxu1 %v712_v33 }
  0x7f   :  { %714 = vmatprep.subr.bf16.mxu1 %v862_v36 }
  0x82   :  { %716 = vmatpush3.bf16.msra.mxu1 %v715_v37 }
  0x83   :  { %717 = vmatprep.subr.bf16.mxu1 %v862_v36 }
  0x86   :  { %719 = vmatpush3.bf16.msra.mxu1 %v718_v40 }
  0x87   :  { %720 = vmatprep.subr.bf16.mxu1 %v862_v36 }
  0x8a   :  { %722 = vmatpush3.bf16.msra.mxu1 %v721_v53 }
  0xca   :  { %v93_v59 = vpop.permute.xlu0 %92 }
  0xcb   :  { %vm94_vm2 = vcmp.eq.s32.totalorder %v93_v59, %v90_v56  ;;  %v496_v59 = vld [vmem:[%s1030_s8] ss:$0 sm:$0xff] }
  0xcc   :  { %v492_v63 = vsel %vm94_vm2, 1.0, %v860_v1 }
  0xcd   :  { %571 = vmatmul.mubr.msk.f32.vlgmr.msra.gmra.mrb[0].mxu0 %vm130_vm1, %v492_v63 }
  0xce   :  { %677 = vmatpush3.bf16.msra.mxu0 %v676_v60  ;;  %605 = vmatprep.mubr.msk.f32.mxu0 %vm861_vm0, %v860_v1  ;;  %v295_v1 = vld [vmem:[#allocation7 + $0x50] sm:$0xff] }
  0xcf   :  { %678 = vmatprep.subr.bf16.mxu0 %v862_v36  ;;  %v691_v12 = vpack.c.bf16 %v296_v11, %v295_v1 }
  0xd2   :  { %680 = vmatpush3.bf16.msra.mxu0 %v679_v0 }
  0xd3   :  { %681 = vmatprep.subr.bf16.mxu0 %v862_v36 }
  0xd6   :  { %683 = vmatpush3.bf16.msra.mxu0 %v682_v4 }
  0xd7   :  { %684 = vmatprep.subr.bf16.mxu0 %v862_v36 }
  0xda   :  { %686 = vmatpush3.bf16.msra.mxu0 %v685_v7 }
  0xdb   :  { %687 = vmatprep.subr.bf16.mxu0 %v862_v36 }
  0xde   :  { %689 = vmatpush3.bf16.msra.mxu0 %v688_v10 }
  0xdf   :  { %690 = vmatprep.subr.bf16.mxu0 %v862_v36 }
  0xe2   :  { %692 = vmatpush3.bf16.msra.mxu0 %v691_v12 }
  0xe3   :  { %693 = vmatprep.subr.bf16.mxu0 %v862_v36 }
  0xe6   :  { %695 = vmatpush3.bf16.msra.mxu0 %v694_v15 }
  0xe7   :  { %696 = vmatprep.subr.bf16.mxu0 %v862_v36  ;;  %v495_v36 = vld [vmem:[%s1028_s6] ss:$0 sm:$0xff] }
  0xea   :  { %698 = vmatpush3.bf16.msra.mxu0 %v697_v18 }
 0x140   :  { %v531_v41 = vpop.f32.mrb[0].mxu1 }
 0x141   :  { %v532_v42 = vpop.f32.mrb[1].mxu1 }
 0x142   :  { %v533_v43 = vadd.f32 %v532_v42, %v531_v41 }
 0x1a0   :  { %v200_v44 = vpop.f32.mrb[0].mxu0 }
 0x1a1   :  { %v271_v46 = vadd.f32 %v533_v43, %v200_v44  ;;  %v572_v47 = vpop.f32.mrb[1].mxu0 }
 0x1a3   :  { %v281_v48 = vadd.f32 %v494_v45, %v271_v46 }
 0x1a5   :  { %v283_v49 = vmul.f32 0.2, %v281_v48  ;;  %vm282_vm3 = vcmp.ge.f32.partialorder %v281_v48, 0.0 }
 0x1a7   :  { %v284_v50 = vsel %vm282_vm3, %v281_v48, %v283_v49 }
 0x1a8   :  { %606 = vmatmul.mubr.f32.vlgmr.msra.gmra.mrb[2].mxu0 %v284_v50 }
 0x27b   :  { %v374_v54 = vpop.f32.mrb[2].mxu0 }
 0x27c   :  { %v375_v55 = vadd.f32 %v495_v36, %v374_v54  ;;  %v607_v56 = vpop.f32.mrb[3].mxu0 }
 0x27e   :  { %vm378_vm4 = vcmp.ge.f32.partialorder %v375_v55, 0.0  ;;  %v379_v57 = vmul.f32 0.2, %v375_v55 }
 0x280   :  { %v380_v58 = vsel %vm378_vm4, %v375_v55, %v379_v57 }
 0x281   :  { %641 = vmatmul.mubr.f32.vlgmr.msra.gmra.mrb[2].mxu1 %v380_v58 }
 0x354   :  { %v470_v60 = vpop.f32.mrb[2].mxu1 }
 0x355   :  { %v471_v61 = vadd.f32 %v496_v59, %v470_v60  ;;  %v642_v62 = vpop.f32.mrb[3].mxu1 }
 0x357   :  { %474 = vst [vmem:[#allocation10] sm:$0xff] %v471_v61 }
 0x358   :  { %834 = shalt.err (!%p831_p8)
}
 0x359   :  { %s835_s0 = scalar_lea.hbm %s1031_s9, 128 }
 0x35a   :  { %p836_p9 = scmp.ne.s32.totalorder %s1031_s9, %s835_s0  ;;  %p839_p10 = scmp.lt.u32.totalorder %s835_s0, %s1031_s9 }
 0x35c   :  { %p841_p11 = pnand %p839_p10, %p836_p9 }
 0x35e   :  { %844 = shalt.err (!%p841_p11)
}
 0x35f   :  { %484 = dma.vmem_to_hbm [thread:$0]  %s482_s22, 128, %s1031_s9, [#allocation4]  }
 0x360   :  { %851 = dma.done.wait [#allocation4], 128  }
 0x361   :  { %852 = vsyncadd [#allocation4], 4294967168 }
 0x362   :  { %488 = vsyncpa [#allocation3], 1 }
 0x363   :  { %489 = vsyncpa [#allocation6], 1 }
 0x364   :  { %490 = vsyncpa [#allocation9], 1 }
 0x365   :  { %491 = vsyncpa [#allocation4], 1 }

</bundles_post_ra>
